<compile_context>
chip_gen: v6e
topology: v6e:2x2x1
jax: 0.10.0
libtpu: 0.0.40
codegen_flags: <defaults>
</compile_context>

<pallas_src>
import jax
import jax.numpy as jnp
from jax.experimental import pallas as pl
from jax.experimental.pallas import tpu as pltpu


# ----------------------------------------------------------------------------
# glue: meshgrid identical to the PyTorch staticmethod
# ----------------------------------------------------------------------------
def meshgrid(resolut, low=-1.0, high=1.0):
    assert len(resolut) == 2
    yx = [jnp.linspace(low, high, r + 1, dtype=jnp.float32) for r in resolut]
    yx = [(v[:-1] + v[1:]) / 2.0 for v in yx]
    grid_y, grid_x = jnp.meshgrid(yx[0], yx[1], indexing="ij")
    return jnp.stack([grid_y, grid_x, 1.0 - grid_y, 1.0 - grid_x], axis=2)  # (H, W, 4)


# ----------------------------------------------------------------------------
# Pallas kernel: pure broadcast add, out = x + pos  (pos shared across batch)
#   pos_ref : (T, 128) f32      x_ref / o_ref : (T, 128)  (batch dim squeezed)
# ----------------------------------------------------------------------------
def _add_pos_kernel(pos_ref, x_ref, o_ref):
    x = x_ref[...].astype(jnp.float32)
    o_ref[...] = (x + pos_ref[...]).astype(o_ref.dtype)


def _pick_tile_rows(rows, max_rows=2048):
    """Largest convenient row tile.

    - Full extent if it already fits (block == full dim, always legal).
    - Otherwise prefer an exact divisor (no partial tail), searched densely in
      steps of 8 down from max_rows, but never below 256 rows (step-overhead
      cliff).
    - Else: largest multiple of 8 <= max_rows, with a partial tail block that
      Pallas clips at the boundary.
    """
    if rows <= max_rows:
        return rows
    cap = (max_rows // 8) * 8
    for t in range(cap, 255, -8):
        if rows % t == 0:
            return t
    return cap


def cartesian_positional_embedding_2d(x, pe, weight, bias, *, donate_x=False):
    """
    x      : (B, H, W, C)
    pe     : (1, H_full, W_full, 4) float32 (only the top-left (H, W) patch used)
    weight : (C, 4)   (PyTorch nn.Linear weight layout: out_features x in_features)
    bias   : (C,)
    returns: (B, H, W, C)
    """
    B, H, W, C = x.shape
    HW = H * W
    flat = HW * C
    lane = 128

    # --- hoisted projection: done once, in f32, outside the kernel -----------
    # Kept in f32 in HBM so low-precision inputs are not double-rounded vs. the
    # reference (its read cost is ~1/B of x and the copy is elided across B).
    pe_flat = pe[0, :H, :W, :].reshape(HW, 4).astype(jnp.float32)
    pos = pe_flat @ weight.T.astype(jnp.float32) + bias.astype(jnp.float32)  # (HW, C) f32

    # --- lane-dense layout: pad fused HW*C axis up to a multiple of 128 ------
    R = pl.cdiv(flat, lane)
    pad = R * lane - flat
    x_flat = x.reshape(B, flat)
    pos_flat = pos.reshape(flat)
    if pad:
        x_flat = jnp.pad(x_flat, ((0, 0), (0, pad)))
        pos_flat = jnp.pad(pos_flat, ((0, pad),))
    x_l = x_flat.reshape(B, R, lane)
    pos_l = pos_flat.reshape(R, lane)

    T = _pick_tile_rows(R)
    n_tiles = pl.cdiv(R, T)

    kwargs = {}
    if donate_x and pad == 0 and x.dtype == jnp.float32:
        # Safe to alias only when x_l is a pure reshape view of x and dtypes match.
        kwargs["input_output_aliases"] = {1: 0}

    out = pl.pallas_call(
        _add_pos_kernel,
        out_shape=jax.ShapeDtypeStruct((B, R, lane), x.dtype),
        grid_spec=pltpu.PrefetchScalarGridSpec(
            num_scalar_prefetch=0,
            # B innermost: consecutive steps reuse the same pos block -> its
            # HBM->VMEM copy is elided instead of repeated per batch element.
            grid=(n_tiles, B),
            in_specs=[
                pl.BlockSpec((T, lane), lambda t, b: (t, 0)),           # pos (shared, f32)
                pl.BlockSpec((None, T, lane), lambda t, b: (b, t, 0)),  # x
            ],
            out_specs=pl.BlockSpec((None, T, lane), lambda t, b: (b, t, 0)),
        ),
        compiler_params=pltpu.CompilerParams(
            dimension_semantics=("parallel", "parallel")),
        **kwargs,
    )(pos_l, x_l)

    out = out.reshape(B, R * lane)
    if pad:
        out = out[:, :flat]
    return out.reshape(B, H, W, C)


# ----------------------------------------------------------------------------
# pure-JAX reference for correctness check
# ----------------------------------------------------------------------------
def reference(x, pe, weight, bias):
    B, H, W, C = x.shape
    proj = jnp.einsum("hwk,ck->hwc", pe[0, :H, :W, :].astype(jnp.float32),
                      weight.astype(jnp.float32)) + bias.astype(jnp.float32)
    return (x.astype(jnp.float32) + proj[None]).astype(x.dtype)


if __name__ == "__main__":
    # small shapes consistent with the module: resolut=(16,16), embed_dim=32
    resolut = (16, 16)
    embed_dim = 32
    B, H, W, C = 2, 16, 16, embed_dim

    key = jax.random.PRNGKey(0)
    kx, kw, kb = jax.random.split(key, 3)

    x = jax.random.normal(kx, (B, H, W, C), dtype=jnp.float32)
    # deterministic Linear(4, embed_dim) params (PyTorch layout: (out, in))
    weight = jax.random.normal(kw, (embed_dim, 4), dtype=jnp.float32) * 0.5
    bias = jax.random.normal(kb, (embed_dim,), dtype=jnp.float32) * 0.1

    pe = meshgrid(resolut)[None, ...]  # (1, H, W, 4), fixed non-trainable param

    out = cartesian_positional_embedding_2d(x, pe, weight, bias)
    out = jax.block_until_ready(out)

    ref = reference(x, pe, weight, bias)
    assert out.shape == (B, H, W, C)
    assert jnp.allclose(out, ref, atol=1e-5, rtol=1e-5), "mismatch vs reference"

    print("KERNEL_OK")
</pallas_src>

<mosaic_0001>
module attributes {stable_mosaic.version = 11 : i64} {
  func.func @_add_pos_kernel(%arg0: i32, %arg1: i32, %arg2: memref<64x128xf32, #tpu.memory_space<vmem>>, %arg3: memref<1x64x128xf32, #tpu.memory_space<vmem>>, %arg4: memref<1x64x128xf32, #tpu.memory_space<vmem>>) attributes {dimension_semantics = [#tpu.dimension_semantics<parallel>, #tpu.dimension_semantics<parallel>], iteration_bounds = array<i64: 1, 2>, scalar_prefetch = 0 : i64, scratch_operands = 0 : i64, tpu.core_type = #tpu.core_type<tc>, window_params = [{transform_indices = @transform_0, window_bounds = array<i64: 64, 128>}, {transform_indices = @transform_1, window_bounds = array<i64: 1, 64, 128>}, {transform_indices = @transform_2, window_bounds = array<i64: 1, 64, 128>}]} {
    %c0 = arith.constant 0 : index
    %c0_0 = arith.constant 0 : index
    %c0_1 = arith.constant 0 : index
    %0 = vector.load %arg3[%c0, %c0_0, %c0_1] : memref<1x64x128xf32, #tpu.memory_space<vmem>>, vector<1x64x128xf32>
    %1 = vector.shape_cast %0 : vector<1x64x128xf32> to vector<64x128xf32>
    %c0_2 = arith.constant 0 : index
    %c0_3 = arith.constant 0 : index
    %2 = vector.load %arg2[%c0_2, %c0_3] : memref<64x128xf32, #tpu.memory_space<vmem>>, vector<64x128xf32>
    %3 = arith.addf %1, %2 : vector<64x128xf32>
    %c0_4 = arith.constant 0 : index
    %c0_5 = arith.constant 0 : index
    %c0_6 = arith.constant 0 : index
    %4 = vector.load %arg4[%c0_4, %c0_5, %c0_6] : memref<1x64x128xf32, #tpu.memory_space<vmem>>, vector<1x64x128xf32>
    %5 = vector.shape_cast %4 : vector<1x64x128xf32> to vector<64x128xf32>
    %6 = vector.shape_cast %3 : vector<64x128xf32> to vector<1x64x128xf32>
    tpu.vector_store %arg4[%c0_4, %c0_5, %c0_6], %6 {strides = array<i32>} : memref<1x64x128xf32, #tpu.memory_space<vmem>>, vector<1x64x128xf32>,
    return
  }
  func.func @transform_0(%arg0: i32, %arg1: i32) -> (i32, i32) {
    %c0_i32 = arith.constant 0 : i32
    %c0_i32_0 = arith.constant 0 : i32
    return %arg0, %c0_i32 : i32, i32
  }
  func.func @transform_1(%arg0: i32, %arg1: i32) -> (i32, i32, i32) {
    %c0_i32 = arith.constant 0 : i32
    %c0_i32_0 = arith.constant 0 : i32
    return %arg1, %arg0, %c0_i32 : i32, i32, i32
  }
  func.func @transform_2(%arg0: i32, %arg1: i32) -> (i32, i32, i32) {
    %c0_i32 = arith.constant 0 : i32
    %c0_i32_0 = arith.constant 0 : i32
    return %arg1, %arg0, %c0_i32 : i32, i32, i32
  }
}

</mosaic_0001>

<bundles_post_ra>
// kernel: tpu_custom_call.1
= control target key start
LH: loop header
LB: loop body
LE: loop exit
PB: predicated region body
PF: predicated region fallthrough
CT: control target
= control target key end

     0   :  { %7 = vsyncpa [#allocation3], 0  ;;  %s800_s0 = inlined_call_operand.hbm [shape: f32[64,128], index: 0, kind: input, shape index: {}]   ;;  %s801_s1 = inlined_call_operand.hbm [shape: f32[2,64,128], index: 1, kind: input, shape index: {}]   ;;  %s802_s2 = inlined_call_operand.hbm [shape: f32[2,64,128], index: 2, kind: output, shape index: {}]  }
   0x1   :  { %8 = vsyncpa [#allocation6], 0 }
   0x2   :  { %10 = vsyncpa [#allocation6 + $0x1], 0 }
   0x3   :  { %11 = vsyncpa [#allocation4], 0 }
   0x4   :  { %13 = vsyncpa [#allocation4 + $0x1], 0  ;;  %s613_s9 = smov 0   ;;  %s615_s10 = smov 0  }
   0x5   :  { %s617_s11 = smov 0   ;;  %s619_s12 = smov 0  }
   0x6   :  { %s621_s13 = smov 0   ;;  %s623_s14 = smov 0  }
   0x7 LB: > { %s355_s15 = sadd.s32 4294967295, %s589_s14   ;;  %s356_s16 = sadd.s32 4294967294, %s589_s14   ;;  %s589_s14 = sphi %s623_s14, %s19_s14   ;;  %s585_s13 = sphi %s621_s13, %s822_s13   ;;  %s581_s12 = sphi %s619_s12, %s821_s12   ;;  %s577_s11 = sphi %s617_s11, %s820_s11   ;;  %s573_s10 = sphi %s615_s10, %s819_s10   ;;  %s569_s9 = sphi %s613_s9, %s818_s9  }
   0x8   : > { %p79_p0 = scmp.ne.s32.totalorder %s573_s10, %s569_s9  ;;  %p647_p1 = scmp.eq.s32.totalorder %s355_s15, 0 }
   0x9   : > { %p651_p2 = scmp.eq.s32.totalorder %s355_s15, 1  ;;  %p111_p3 = scmp.eq.s32.totalorder %s356_s16, 1 }
   0xa   : > { %p657_p4 = por %p647_p1, %p79_p0  ;;  %p357_p5 = scmp.ge.s32.totalorder %s589_s14, 1 }
   0xb   : > { %p662_p6 = por %p111_p3, %p79_p0  ;;  %p118_p7 = scmp.lt.s32.totalorder %s589_s14, 3 }
   0xc   : > { %s807_s19 = scalar_select %p657_p4, 1, 0 }
   0xd   : > { %s808_s20 = scalar_select %p662_p6, 1, 0 }
   0xe   : > { %p667_p8 = pnand %p357_p5, %p118_p7  ;;  %s591_s22 = smov [#allocation2]  }
   0xf   : > { %s133_s23 = sshll.u32 %s591_s22, 4  ;;  %s28_s25 = sadd.s32 1, %s585_s13  ;;  %s134_s23 = int_to_ptr.vmem [resolvable:$true] %s133_s23 }
  0x10   : > { %p382_p9 = pneg %p667_p8  ;;  %s462_s26 = scalar_lea.vmem %s134_s23, 1024 }
  0x11   : > { %p463_p13 = scmp.ne.s32.totalorder %s134_s23, %s462_s26  ;;  %p470_p5 = scmp.lt.s32.totalorder %s134_s23, %s134_s23 }
  0x12   : > { %p676_p11 = pnand %p382_p9, %p647_p1  ;;  %p471_p7 = scmp.lt.s32.totalorder %s462_s26, %s462_s26 }
  0x14   : > { %p453_p12 = pneg %p676_p11  ;;  %p472_p6 = por %p471_p7, %p470_p5 }
  0x16   : > { %p465_p0 = pnand %p463_p13, %p453_p12 }
  0x18   : > { %p466_p3 = pneg %p465_p0 }
  0x1a   : > { %p473_p4 = pnand %p472_p6, %p466_p3 }
  0x1c   : > { %476 = shalt.err (!%p473_p4)
}
  0x1d   : > { %s804_s27 = smov 128   ;;  %s593_s28 = smov 8  }
  0x1e   : > { %385 = dma.hbm_to_vmem [thread:$0]  (!%p676_p11), %s800_s0, 1024, %s134_s23, [#allocation3], %s804_s27, %s804_s27, %s593_s28  }
  0x1f   : > { %p29_p4 = scmp.ge.s32.totalorder %s28_s25, 2  ;;  %s66_s3 = sadd.s32 1, %s577_s11 }
  0x20   : > { %p73_p6 = scmp.ne.s32.totalorder %s577_s11, %s573_s10  ;;  %p74_p9 = scmp.eq.s32.totalorder %s589_s14, 0 }
  0x21   : > { %s824_s25 = smov (%p29_p4, %s28_s25), 0  ;;  %p395_p0 = scmp.lt.s32.totalorder %s589_s14, 2 }
  0x22   : > { %p697_p12 = por %p74_p9, %p73_p6  ;;  %p703_p13 = por %p651_p2, %p73_p6 }
  0x23   : > { %s61_s6 = ssub.s32 %s585_s13, %s824_s25  ;;  %s147_s7 = sand.u32 1, %s577_s11  }
  0x24   : > { %p64_p11 = scmp.eq.s32.totalorder %s61_s6, 0  ;;  %s360_s8 = sshll.u32 %s147_s7, 6 }
  0x25   : > { %s372_s16 = sshll.u32 %s585_s13, 10  ;;  %s151_s26 = scalar_lea.vmem [#allocation5], %s360_s8 }
  0x26   : > { %s712_s15 = scalar_select %p64_p11, %s577_s11, %s66_s3  }
  0x27   : > { %s159_s24 = scalar_lea.hbm %s801_s1, %s372_s16  ;;  %s160_s29 = sshll.u32 %s151_s26, 4  ;;  %s161_s29 = int_to_ptr.vmem [resolvable:$true] %s160_s29 }
  0x28   : > { %p720_p2 = pnand %p395_p0, %p697_p12  ;;  %s148_s30 = scalar_lea.sflag [#allocation6], %s147_s7 }
  0x29   : > { %s490_s6 = scalar_lea.vmem %s161_s29, 1024  ;;  %s594_s3 = smov [#allocation5]  }
  0x2a   : > { %p479_p3 = pneg %p720_p2  ;;  %p491_p5 = scmp.ne.s32.totalorder %s161_s29, %s490_s6 }
  0x2b   : > { %s495_s27 = sshll.u32 %s594_s3, 4  ;;  %s496_s27 = int_to_ptr.vmem [resolvable:$false] %s495_s27 }
  0x2c   : > { %p493_p7 = pnand %p491_p5, %p479_p3  ;;  %s497_s16 = scalar_lea.vmem %s496_s27, 2048 }
  0x2d   : > { %p498_p6 = scmp.lt.s32.totalorder %s161_s29, %s496_s27  ;;  %p499_p9 = scmp.lt.s32.totalorder %s497_s16, %s490_s6 }
  0x2e   : > { %p494_p4 = pneg %p493_p7 }
  0x2f   : > { %p500_p11 = por %p499_p9, %p498_p6 }
  0x31   : > { %p501_p10 = pnand %p500_p11, %p494_p4 }
  0x33   : > { %504 = shalt.err (!%p501_p10)
}
  0x34   : > { %s814_s4 = smov 128   ;;  %172 = sbr.rel (%p667_p8) target bundleno = 87 (0x57), region = 28 }
  0x35   : > { %389 = dma.hbm_to_vmem [thread:$0]  (!%p720_p2), %s159_s24, 1024, %s161_s29, %s148_s30, %s814_s4, %s814_s4, %s593_s28  }
  0x39   : > { %556 = dma.done.wait (%p647_p1), [#allocation3], 1024  }
  0x3a   : > { %558 = vsyncadd (%p647_p1), [#allocation3], 4294966272  ;;  %s738_s27 = sand.u32 1, %s573_s10   ;;  %p815_p10 = scmp.ne.s32.totalorder %s807_s19, 0 }
  0x3b   : > { %s365_s7 = sshll.u32 %s738_s27, 6  ;;  %s179_s8 = scalar_lea.sflag [#allocation6], %s738_s27 }
  0x3c   : > { %s182_s22 = scalar_lea.vmem [#allocation5], %s365_s7 }
  0x3d   : > { %560 = dma.done.wait (%p815_p10), %s179_s8, 1024  }
  0x3e   : > { %562 = vsyncadd (%p815_p10), %s179_s8, 4294966272  ;;  %v206_v0 = vld [vmem:[%s182_s22] sm:$0xff]  ;;  %v207_v2 = vld [vmem:[%s182_s22 + $0x8] sm:$0xff]  ;;  %s202_s17 = scalar_lea.vmem [#allocation7], %s365_s7  ;;  %s373_s28 = sshll.u32 %s581_s12, 10 }
  0x3f   : > { %v214_v1 = vld [vmem:[#allocation2] sm:$0xff]  ;;  %v215_v4 = vld [vmem:[#allocation2 + $0x8] sm:$0xff]  ;;  %v208_v5 = vld [vmem:[%s182_s22 + $0x10] sm:$0xff]  ;;  %s254_s21 = sshll.u32 %s202_s17, 4  ;;  %s752_s23 = scalar_lea.hbm %s802_s2, %s373_s28  ;;  %s747_s21 = int_to_ptr.vmem [resolvable:$true] %s254_s21 }
  0x40   : > { %v222_v3 = vadd.f32 %v214_v1, %v206_v0  ;;  %v216_v6 = vld [vmem:[#allocation2 + $0x10] sm:$0xff]  ;;  %v223_v7 = vadd.f32 %v215_v4, %v207_v2  ;;  %v209_v9 = vld [vmem:[%s182_s22 + $0x18] sm:$0xff]  ;;  %v210_v11 = vld [vmem:[%s182_s22 + $0x20] sm:$0xff]  ;;  %s239_s24 = scalar_lea.sflag [#allocation4], %s738_s27  ;;  %s505_s26 = scalar_lea.vmem %s747_s21, 1024 }
  0x41   : > { %v224_v8 = vadd.f32 %v216_v6, %v208_v5  ;;  %v217_v10 = vld [vmem:[#allocation2 + $0x18] sm:$0xff]  ;;  %v218_v13 = vld [vmem:[#allocation2 + $0x20] sm:$0xff]  ;;  %v211_v14 = vld [vmem:[%s182_s22 + $0x28] sm:$0xff]  ;;  %p506_p1 = scmp.ne.s32.totalorder %s747_s21, %s505_s26  ;;  %s595_s29 = smov [#allocation7]  }
  0x42   : > { %230 = vst [vmem:[%s202_s17] sm:$0xff] %v222_v3  ;;  %v225_v12 = vadd.f32 %v217_v10, %v209_v9  ;;  %v219_v15 = vld [vmem:[#allocation2 + $0x28] sm:$0xff]  ;;  %231 = vst [vmem:[%s202_s17 + $0x8] sm:$0xff] %v223_v7  ;;  %v226_v16 = vadd.f32 %v218_v13, %v210_v11  ;;  %v212_v18 = vld [vmem:[%s182_s22 + $0x30] sm:$0xff]  ;;  %s509_s18 = sshll.u32 %s595_s29, 4  ;;  %s510_s18 = int_to_ptr.vmem [resolvable:$false] %s509_s18 }
  0x43   : > { %232 = vst [vmem:[%s202_s17 + $0x10] sm:$0xff] %v224_v8  ;;  %v227_v17 = vadd.f32 %v219_v15, %v211_v14  ;;  %v220_v19 = vld [vmem:[#allocation2 + $0x30] sm:$0xff]  ;;  %v213_v20 = vld [vmem:[%s182_s22 + $0x38] sm:$0xff]  ;;  %p507_p8 = pnand %p506_p1, %p703_p13  ;;  %s511_s30 = scalar_lea.vmem %s510_s18, 2048 }
  0x44   : > { %233 = vst [vmem:[%s202_s17 + $0x18] sm:$0xff] %v225_v12  ;;  %v228_v21 = vadd.f32 %v220_v19, %v212_v18  ;;  %v221_v22 = vld [vmem:[#allocation2 + $0x38] sm:$0xff]  ;;  %234 = vst [vmem:[%s202_s17 + $0x20] sm:$0xff] %v226_v16  ;;  %p512_p0 = scmp.lt.s32.totalorder %s747_s21, %s510_s18  ;;  %p513_p2 = scmp.lt.s32.totalorder %s511_s30, %s505_s26 }
  0x45   : > { %235 = vst [vmem:[%s202_s17 + $0x28] sm:$0xff] %v227_v17  ;;  %v229_v23 = vadd.f32 %v221_v22, %v213_v20  ;;  %p508_p12 = pneg %p507_p8 }
  0x46   : > { %236 = vst [vmem:[%s202_s17 + $0x30] sm:$0xff] %v228_v21  ;;  %p514_p3 = por %p513_p2, %p512_p0 }
  0x47   : > { %237 = vst [vmem:[%s202_s17 + $0x38] sm:$0xff] %v229_v23 }
  0x48   : > { %p515_p5 = pnand %p514_p3, %p508_p12 }
  0x4a   : > { %518 = shalt.err (!%p515_p5)
}
  0x4b   : > { %s519_s6 = scalar_lea.hbm %s752_s23, 1024  ;;  %s523_s4 = scalar_lea.hbm %s802_s2, 2048 }
  0x4c   : > { %p520_p7 = scmp.ne.s32.totalorder %s752_s23, %s519_s6  ;;  %p524_p9 = scmp.lt.s32.totalorder %s752_s23, %s802_s2 }
  0x4d   : > { %p525_p11 = scmp.lt.s32.totalorder %s523_s4, %s519_s6 }
  0x4e   : > { %p521_p4 = pnand %p520_p7, %p703_p13 }
  0x4f   : > { %p526_p10 = por %p525_p11, %p524_p9 }
  0x50   : > { %p522_p6 = pneg %p521_p4 }
  0x52   : > { %p527_p1 = pnand %p526_p10, %p522_p6 }
  0x54   : > { %530 = shalt.err (!%p527_p1)
}
  0x55   : > { %s596_s22 = smov 128   ;;  %s597_s17 = smov 8  }
  0x56   : > { %380 = dma.vmem_to_hbm [thread:$0]  (%p703_p13), %s747_s21, 1024, %s752_s23, %s239_s24, %s596_s22, %s596_s22, %s597_s17  }
  0x57 PF: > { %s269_s28 = sand.u32 1, %s569_s9   ;;  %p816_p8 = scmp.ne.s32.totalorder %s808_s20, 0 }
  0x58   : > { %p817_p12 = scmp.ge.s32.totalorder %s589_s14, 2  ;;  %s270_s12 = scalar_lea.sflag [#allocation4], %s269_s28 }
  0x5a   : > { %p391_p0 = pnand %p817_p12, %p816_p8 }
  0x5c   : > { %p392_p2 = pneg %p391_p0 }
  0x5e   : > { %564 = dma.done.wait (%p392_p2), %s270_s12, 1024  }
  0x5f   : > { %566 = vsyncadd (%p392_p2), %s270_s12, 4294966272  ;;  %s19_s14 = sadd.s32 1, %s589_s14   ;;  %s818_s9 = smov %s573_s10 }
  0x60   : > { %p16_p3 = scmp.ge.s32.totalorder %s19_s14, 4   ;;  %s819_s10 = smov %s577_s11 }
  0x61   : > { %s820_s11 = smov %s712_s15  ;;  %s821_s12 = smov %s585_s13 }
  0x62   : > { %s822_s13 = smov %s824_s25  ;;  %18 = sbr.rel (!%p16_p3) target bundleno = 7 (0x7), region = 79 }
  0x67   :  { %275 = vsyncpa [#allocation3], 1 }
  0x68   :  { %277 = vsyncpa [#allocation3 + $0x1], 1 }
  0x69   :  { %278 = vsyncpa [#allocation6], 1 }
  0x6a   :  { %280 = vsyncpa [#allocation6 + $0x1], 1 }
  0x6b   :  { %281 = vsyncpa [#allocation4], 1 }
  0x6c   :  { %283 = vsyncpa [#allocation4 + $0x1], 1 }

</bundles_post_ra>
